<compile_context>
chip_gen: v6e
topology: v6e:2x2x1
jax: 0.10.0
libtpu: 0.0.40
codegen_flags: <defaults>
</compile_context>

<pallas_src>
from functools import partial

import jax
import jax.numpy as jnp
from jax.experimental import pallas as pl
from jax.experimental.pallas import tpu as pltpu

LANES = 128


def _round_up(x, m):
    return (x + m - 1) // m * m


def rnn_classify_kernel(tok_ref, emb_bd_ref, whh_bd_ref, wc_bd_ref, bc_ref, out_ref):
    """Fused one-hot gather + lane-packed Elman recurrence + final Linear.

    tok_ref    : VMEM [1, T*R, G*Vpad] int32  group-shifted token ids (broadcast over Vpad lanes)
    emb_bd_ref : VMEM [G*Vpad, 128]    f32    block-diag folded table (emb@W_ih^T + b_ih + b_hh)
    whh_bd_ref : VMEM [128, 128]       bf16   block-diag W_hh^T
    wc_bd_ref  : VMEM [128, G*Cpad]    bf16   block-diag W_cls^T
    bc_ref     : VMEM [1, G*Cpad]      f32    b_cls replicated per lane group
    out_ref    : VMEM [1, R, G*Cpad]   f32    lane-packed logits
    """
    _, P, Q = tok_ref.shape            # P = T*R rows, Q = G*Vpad lanes
    R = out_ref.shape[1]
    T = P // R

    # --- 1) Gather (hoisted ahead of the serial chain): one-hot built from an iota
    #        compare, one MXU matmul against the block-diagonal folded embedding table.
    #        Result is already in the lane-packed [t-major rows, G groups of D] layout.
    lane = jax.lax.broadcasted_iota(jnp.int32, (P, Q), 1)
    onehot = (tok_ref[0] == lane).astype(jnp.float32)                     # [P, Q]
    x_packed = jnp.dot(onehot, emb_bd_ref[...],
                       preferred_element_type=jnp.float32)                # [P, 128]

    # --- 2) Elman recurrence. Hidden state is lane-packed ([R, 128] = G groups of D)
    #        and carried in vregs; one bf16 matmul sits on the serial chain per step.
    #        T=8 is small & static -> full unroll is fine.
    #        TODO(synk): switch to lax.fori_loop(..., unroll=2) if sentence_length grows.
    whh = whh_bd_ref[...]
    h = jnp.zeros((R, whh.shape[1]), jnp.float32)
    for t in range(T):
        pre = x_packed[t * R:(t + 1) * R, :] + jnp.dot(
            h.astype(jnp.bfloat16), whh, preferred_element_type=jnp.float32)
        h = jnp.tanh(pre)

    # --- 3) Classifier on the last hidden state (== rnn_out[:, -1, :] for nn.RNN).
    out_ref[0] = (jnp.dot(h.astype(jnp.bfloat16), wc_bd_ref[...],
                          preferred_element_type=jnp.float32)
                  + bc_ref[...])


def prepare_params(emb_table, w_ih, w_hh, b_ih, b_hh, w_cls, b_cls):
    """One-time parameter prep: fold, pad, block-diagonalize, cast (hoisted out of calls)."""
    V, D = emb_table.shape
    C = w_cls.shape[0]
    assert D <= LANES, "TODO(synk): hidden sizes > 128 need a different packing scheme"
    dpad = next(p for p in (8, 16, 32, 64, 128) if p >= D)
    groups = LANES // dpad                      # independent batch items packed per lane row
    vpad = _round_up(V, 32)
    cpad = _round_up(C, 32)
    f32 = jnp.float32

    # Fold Embedding + input projection + both RNN biases into a single [V, D] table.
    emb_proj = (emb_table.astype(f32) @ w_ih.T.astype(f32) + (b_ih + b_hh).astype(f32))
    emb_proj = jnp.zeros((vpad, dpad), f32).at[:V, :D].set(emb_proj)
    whh_t = jnp.zeros((dpad, dpad), f32).at[:D, :D].set(w_hh.T.astype(f32))
    wc_t = jnp.zeros((dpad, cpad), f32).at[:D, :C].set(w_cls.T.astype(f32))

    def block_diag(block, g):
        r, c = block.shape
        out = jnp.zeros((g * r, g * c), block.dtype)
        for i in range(g):
            out = out.at[i * r:(i + 1) * r, i * c:(i + 1) * c].set(block)
        return out

    emb_bd = block_diag(emb_proj, groups)                          # [G*Vpad, 128]  f32
    whh_bd = block_diag(whh_t, groups).astype(jnp.bfloat16)        # [128, 128]
    wc_bd = block_diag(wc_t, groups).astype(jnp.bfloat16)          # [128, G*Cpad]
    bc = jnp.zeros((1, groups * cpad), f32)
    for g in range(groups):
        bc = bc.at[0, g * cpad:g * cpad + C].set(b_cls.astype(f32))

    return dict(emb_bd=emb_bd, whh_bd=whh_bd, wc_bd=wc_bd, bc=bc,
                num_classes=C, vpad=vpad, cpad=cpad, dpad=dpad, groups=groups)


@partial(jax.jit, static_argnames=("num_classes", "vpad", "cpad", "groups", "rows"))
def _rnn_classify_call(tokens, emb_bd, whh_bd, wc_bd, bc, *,
                       num_classes, vpad, cpad, groups, rows):
    B, T = tokens.shape
    G, R = groups, rows
    BB = R * G                                   # sequences per grid step (sublanes x groups)
    nt = pl.cdiv(B, BB)
    b_pad = nt * BB

    # --- per-call token prep (tiny int32 reshuffle; stays in XLA outside the kernel) ----
    # Clamp so even bad ids can never alias another lane group inside the kernel.
    tok = jnp.clip(tokens.astype(jnp.int32), 0, vpad - 1)
    tok = jnp.zeros((b_pad, T), jnp.int32).at[:B].set(tok)        # pad batch with token 0
    tok = tok.reshape(nt, R, G, T)                                # item b = i*BB + r*G + g
    # Shift each lane-group's ids so the kernel compares against a plain lane iota.
    tok = tok + (jnp.arange(G, dtype=jnp.int32) * vpad)[None, None, :, None]
    tok = jnp.transpose(tok, (0, 3, 1, 2))                        # [nt, T, R, G]
    tok = jnp.repeat(tok, vpad, axis=3)                           # [nt, T, R, G*Vpad]
    tok = tok.reshape(nt, T * R, G * vpad)
    # NOTE: fine at V=30; for large vocab fall back to a per-row DMA gather instead of
    # the one-hot expansion (TODO(synk)).

    GV, GC = G * vpad, G * cpad
    out_packed = pl.pallas_call(
        rnn_classify_kernel,
        out_shape=jax.ShapeDtypeStruct((nt, R, GC), jnp.float32),
        grid_spec=pltpu.PrefetchScalarGridSpec(
            num_scalar_prefetch=0,
            grid=(nt,),
            in_specs=[
                pl.BlockSpec((1, T * R, GV), lambda i: (i, 0, 0)),   # tokens (per batch tile)
                pl.BlockSpec((GV, LANES), lambda i: (0, 0)),         # folded emb table (block-diag)
                pl.BlockSpec((LANES, LANES), lambda i: (0, 0)),      # W_hh^T (block-diag)
                pl.BlockSpec((LANES, GC), lambda i: (0, 0)),         # W_cls^T (block-diag, padded)
                pl.BlockSpec((1, GC), lambda i: (0, 0)),             # b_cls (padded)
            ],
            out_specs=pl.BlockSpec((1, R, GC), lambda i: (i, 0, 0)),
        ),
        compiler_params=pltpu.CompilerParams(
            dimension_semantics=("parallel",)),   # batch tiles shard across TCs on v7x
    )(tok, emb_bd, whh_bd, wc_bd, bc)

    # --- unpack lane groups: [nt, R, G, Cpad] -> [B, C] --------------------------------
    logits = out_packed.reshape(nt, R, G, cpad).reshape(b_pad, cpad)
    return logits[:B, :num_classes]


def torch_model_forward(tokens, params, rows=8):
    """Inference forward (y=None branch): returns logits [B, sentence_length+1]."""
    return _rnn_classify_call(
        tokens, params["emb_bd"], params["whh_bd"], params["wc_bd"], params["bc"],
        num_classes=params["num_classes"], vpad=params["vpad"],
        cpad=params["cpad"], groups=params["groups"], rows=rows)


def reference_forward(tokens, emb_table, w_ih, w_hh, b_ih, b_hh, w_cls, b_cls):
    """Pure-JAX f32 reference mirroring the PyTorch semantics."""
    x = emb_table[tokens]                         # [B, T, D]
    B, T, D = x.shape
    h = jnp.zeros((B, D), jnp.float32)
    for t in range(T):
        h = jnp.tanh(x[:, t, :] @ w_ih.T + b_ih + h @ w_hh.T + b_hh)
    return h @ w_cls.T + b_cls


if __name__ == "__main__":
    # Model hyper-params (small, consistent with the PyTorch module's __init__).
    vector_dim = 32          # D (embedding dim == RNN hidden dim)
    sentence_length = 8      # T
    vocab_size = 30          # len(vocab)
    batch = 64               # many sequences per call -> 2 grid steps of 32 (amortizes launch)
    num_classes = sentence_length + 1

    key = jax.random.PRNGKey(0)
    k_emb, k_wih, k_whh, k_bih, k_bhh, k_wc, k_bc, k_tok = jax.random.split(key, 8)

    # Deterministic synthetic parameters (shapes follow PyTorch layouts).
    emb_table = jax.random.normal(k_emb, (vocab_size, vector_dim), jnp.float32)
    w_ih = jax.random.normal(k_wih, (vector_dim, vector_dim), jnp.float32) * 0.1
    w_hh = jax.random.normal(k_whh, (vector_dim, vector_dim), jnp.float32) * 0.1
    b_ih = jax.random.normal(k_bih, (vector_dim,), jnp.float32) * 0.1
    b_hh = jax.random.normal(k_bhh, (vector_dim,), jnp.float32) * 0.1
    w_cls = jax.random.normal(k_wc, (num_classes, vector_dim), jnp.float32) * 0.1
    b_cls = jax.random.normal(k_bc, (num_classes,), jnp.float32) * 0.1

    tokens = jax.random.randint(k_tok, (batch, sentence_length), 0, vocab_size,
                                dtype=jnp.int32)

    # One-time parameter prep (fold embedding projection, pad, block-diagonalize, cast).
    params = prepare_params(emb_table, w_ih, w_hh, b_ih, b_hh, w_cls, b_cls)

    logits = torch_model_forward(tokens, params)
    logits = jax.block_until_ready(logits)

    ref = reference_forward(tokens, emb_table, w_ih, w_hh, b_ih, b_hh, w_cls, b_cls)
    assert logits.shape == (batch, num_classes)
    # bf16 recurrence / classifier weights -> slightly looser tolerance than pure f32.
    assert jnp.allclose(logits, ref, atol=2e-2, rtol=2e-2), float(
        jnp.max(jnp.abs(logits - ref)))

    print("KERNEL_OK")
</pallas_src>

<mosaic_0001>
module attributes {stable_mosaic.version = 11 : i64} {
  func.func @rnn_classify_kernel(%arg0: i32, %arg1: memref<1x64x128xi32, #tpu.memory_space<vmem>>, %arg2: memref<128x128xf32, #tpu.memory_space<vmem>>, %arg3: memref<128x128xbf16, #tpu.memory_space<vmem>>, %arg4: memref<128x128xbf16, #tpu.memory_space<vmem>>, %arg5: memref<1x128xf32, #tpu.memory_space<vmem>>, %arg6: memref<1x8x128xf32, #tpu.memory_space<vmem>>) attributes {dimension_semantics = [#tpu.dimension_semantics<parallel>], iteration_bounds = array<i64: 2>, scalar_prefetch = 0 : i64, scratch_operands = 0 : i64, tpu.core_type = #tpu.core_type<tc>, window_params = [{transform_indices = @transform_0, window_bounds = array<i64: 1, 64, 128>}, {pipeline_mode = #tpu.pipeline_mode<synchronous>, transform_indices = @transform_1, window_bounds = array<i64: 128, 128>}, {pipeline_mode = #tpu.pipeline_mode<synchronous>, transform_indices = @transform_2, window_bounds = array<i64: 128, 128>}, {pipeline_mode = #tpu.pipeline_mode<synchronous>, transform_indices = @transform_3, window_bounds = array<i64: 128, 128>}, {pipeline_mode = #tpu.pipeline_mode<synchronous>, transform_indices = @transform_4, window_bounds = array<i64: 1, 128>}, {transform_indices = @transform_5, window_bounds = array<i64: 1, 8, 128>}]} {
    %0 = tpu.iota {dimensions = array<i32: 1>} : vector<64x128xi32>
    %c0 = arith.constant 0 : index
    %c0_0 = arith.constant 0 : index
    %c0_1 = arith.constant 0 : index
    %1 = vector.load %arg1[%c0, %c0_0, %c0_1] : memref<1x64x128xi32, #tpu.memory_space<vmem>>, vector<1x64x128xi32>
    %2 = vector.shape_cast %1 : vector<1x64x128xi32> to vector<64x128xi32>
    %3 = arith.cmpi eq, %2, %0 : vector<64x128xi32>
    %4 = arith.extui %3 : vector<64x128xi1> to vector<64x128xi32>
    %5 = arith.sitofp %4 : vector<64x128xi32> to vector<64x128xf32>
    %c0_2 = arith.constant 0 : index
    %c0_3 = arith.constant 0 : index
    %6 = vector.load %arg2[%c0_2, %c0_3] : memref<128x128xf32, #tpu.memory_space<vmem>>, vector<128x128xf32>
    %cst = arith.constant dense<0.000000e+00> : vector<64x128xf32>
    %7 = tpu.matmul %5, %6, %cst {dimension_numbers = #tpu.dot_dimension_numbers<[1], [0], [0], [1], [0, 0, 1, 1], [], []>} : vector<64x128xf32>, vector<128x128xf32>, vector<64x128xf32> -> vector<64x128xf32>
    %c0_4 = arith.constant 0 : index
    %c0_5 = arith.constant 0 : index
    %8 = vector.load %arg3[%c0_4, %c0_5] : memref<128x128xbf16, #tpu.memory_space<vmem>>, vector<128x128xbf16>
    %cst_6 = arith.constant 0.000000e+00 : f32
    %9 = vector.broadcast %cst_6 : f32 to vector<8x128xf32>
    %10 = vector.extract_strided_slice %7 {offsets = [0, 0], sizes = [8, 128], strides = [1, 1]} : vector<64x128xf32> to vector<8x128xf32>
    %11 = arith.truncf %9 : vector<8x128xf32> to vector<8x128xbf16>
    %cst_7 = arith.constant dense<0.000000e+00> : vector<8x128xf32>
    %12 = tpu.matmul %11, %8, %cst_7 {dimension_numbers = #tpu.dot_dimension_numbers<[1], [0], [0], [1], [0, 0, 1, 1], [], []>} : vector<8x128xbf16>, vector<128x128xbf16>, vector<8x128xf32> -> vector<8x128xf32>
    %13 = arith.addf %10, %12 : vector<8x128xf32>
    %14 = math.tanh %13 : vector<8x128xf32>
    %15 = vector.extract_strided_slice %7 {offsets = [8, 0], sizes = [8, 128], strides = [1, 1]} : vector<64x128xf32> to vector<8x128xf32>
    %16 = arith.truncf %14 : vector<8x128xf32> to vector<8x128xbf16>
    %cst_8 = arith.constant dense<0.000000e+00> : vector<8x128xf32>
    %17 = tpu.matmul %16, %8, %cst_8 {dimension_numbers = #tpu.dot_dimension_numbers<[1], [0], [0], [1], [0, 0, 1, 1], [], []>} : vector<8x128xbf16>, vector<128x128xbf16>, vector<8x128xf32> -> vector<8x128xf32>
    %18 = arith.addf %15, %17 : vector<8x128xf32>
    %19 = math.tanh %18 : vector<8x128xf32>
    %20 = vector.extract_strided_slice %7 {offsets = [16, 0], sizes = [8, 128], strides = [1, 1]} : vector<64x128xf32> to vector<8x128xf32>
    %21 = arith.truncf %19 : vector<8x128xf32> to vector<8x128xbf16>
    %cst_9 = arith.constant dense<0.000000e+00> : vector<8x128xf32>
    %22 = tpu.matmul %21, %8, %cst_9 {dimension_numbers = #tpu.dot_dimension_numbers<[1], [0], [0], [1], [0, 0, 1, 1], [], []>} : vector<8x128xbf16>, vector<128x128xbf16>, vector<8x128xf32> -> vector<8x128xf32>
    %23 = arith.addf %20, %22 : vector<8x128xf32>
    %24 = math.tanh %23 : vector<8x128xf32>
    %25 = vector.extract_strided_slice %7 {offsets = [24, 0], sizes = [8, 128], strides = [1, 1]} : vector<64x128xf32> to vector<8x128xf32>
    %26 = arith.truncf %24 : vector<8x128xf32> to vector<8x128xbf16>
    %cst_10 = arith.constant dense<0.000000e+00> : vector<8x128xf32>
    %27 = tpu.matmul %26, %8, %cst_10 {dimension_numbers = #tpu.dot_dimension_numbers<[1], [0], [0], [1], [0, 0, 1, 1], [], []>} : vector<8x128xbf16>, vector<128x128xbf16>, vector<8x128xf32> -> vector<8x128xf32>
    %28 = arith.addf %25, %27 : vector<8x128xf32>
    %29 = math.tanh %28 : vector<8x128xf32>
    %30 = vector.extract_strided_slice %7 {offsets = [32, 0], sizes = [8, 128], strides = [1, 1]} : vector<64x128xf32> to vector<8x128xf32>
    %31 = arith.truncf %29 : vector<8x128xf32> to vector<8x128xbf16>
    %cst_11 = arith.constant dense<0.000000e+00> : vector<8x128xf32>
    %32 = tpu.matmul %31, %8, %cst_11 {dimension_numbers = #tpu.dot_dimension_numbers<[1], [0], [0], [1], [0, 0, 1, 1], [], []>} : vector<8x128xbf16>, vector<128x128xbf16>, vector<8x128xf32> -> vector<8x128xf32>
    %33 = arith.addf %30, %32 : vector<8x128xf32>
    %34 = math.tanh %33 : vector<8x128xf32>
    %35 = vector.extract_strided_slice %7 {offsets = [40, 0], sizes = [8, 128], strides = [1, 1]} : vector<64x128xf32> to vector<8x128xf32>
    %36 = arith.truncf %34 : vector<8x128xf32> to vector<8x128xbf16>
    %cst_12 = arith.constant dense<0.000000e+00> : vector<8x128xf32>
    %37 = tpu.matmul %36, %8, %cst_12 {dimension_numbers = #tpu.dot_dimension_numbers<[1], [0], [0], [1], [0, 0, 1, 1], [], []>} : vector<8x128xbf16>, vector<128x128xbf16>, vector<8x128xf32> -> vector<8x128xf32>
    %38 = arith.addf %35, %37 : vector<8x128xf32>
    %39 = math.tanh %38 : vector<8x128xf32>
    %40 = vector.extract_strided_slice %7 {offsets = [48, 0], sizes = [8, 128], strides = [1, 1]} : vector<64x128xf32> to vector<8x128xf32>
    %41 = arith.truncf %39 : vector<8x128xf32> to vector<8x128xbf16>
    %cst_13 = arith.constant dense<0.000000e+00> : vector<8x128xf32>
    %42 = tpu.matmul %41, %8, %cst_13 {dimension_numbers = #tpu.dot_dimension_numbers<[1], [0], [0], [1], [0, 0, 1, 1], [], []>} : vector<8x128xbf16>, vector<128x128xbf16>, vector<8x128xf32> -> vector<8x128xf32>
    %43 = arith.addf %40, %42 : vector<8x128xf32>
    %44 = math.tanh %43 : vector<8x128xf32>
    %45 = vector.extract_strided_slice %7 {offsets = [56, 0], sizes = [8, 128], strides = [1, 1]} : vector<64x128xf32> to vector<8x128xf32>
    %46 = arith.truncf %44 : vector<8x128xf32> to vector<8x128xbf16>
    %cst_14 = arith.constant dense<0.000000e+00> : vector<8x128xf32>
    %47 = tpu.matmul %46, %8, %cst_14 {dimension_numbers = #tpu.dot_dimension_numbers<[1], [0], [0], [1], [0, 0, 1, 1], [], []>} : vector<8x128xbf16>, vector<128x128xbf16>, vector<8x128xf32> -> vector<8x128xf32>
    %48 = arith.addf %45, %47 : vector<8x128xf32>
    %49 = math.tanh %48 : vector<8x128xf32>
    %50 = arith.truncf %49 : vector<8x128xf32> to vector<8x128xbf16>
    %c0_15 = arith.constant 0 : index
    %c0_16 = arith.constant 0 : index
    %51 = vector.load %arg4[%c0_15, %c0_16] : memref<128x128xbf16, #tpu.memory_space<vmem>>, vector<128x128xbf16>
    %cst_17 = arith.constant dense<0.000000e+00> : vector<8x128xf32>
    %52 = tpu.matmul %50, %51, %cst_17 {dimension_numbers = #tpu.dot_dimension_numbers<[1], [0], [0], [1], [0, 0, 1, 1], [], []>} : vector<8x128xbf16>, vector<128x128xbf16>, vector<8x128xf32> -> vector<8x128xf32>
    %c0_18 = arith.constant 0 : index
    %c0_19 = arith.constant 0 : index
    %53 = vector.load %arg5[%c0_18, %c0_19] : memref<1x128xf32, #tpu.memory_space<vmem>>, vector<1x128xf32>
    %54 = vector.broadcast %53 : vector<1x128xf32> to vector<8x128xf32>
    %55 = arith.addf %52, %54 : vector<8x128xf32>
    %c0_20 = arith.constant 0 : index
    %c0_21 = arith.constant 0 : index
    %c0_22 = arith.constant 0 : index
    %56 = vector.load %arg6[%c0_20, %c0_21, %c0_22] : memref<1x8x128xf32, #tpu.memory_space<vmem>>, vector<1x8x128xf32>
    %57 = vector.shape_cast %56 : vector<1x8x128xf32> to vector<8x128xf32>
    %58 = vector.shape_cast %55 : vector<8x128xf32> to vector<1x8x128xf32>
    tpu.vector_store %arg6[%c0_20, %c0_21, %c0_22], %58 {strides = array<i32>} : memref<1x8x128xf32, #tpu.memory_space<vmem>>, vector<1x8x128xf32>,
    return
  }
  func.func @transform_0(%arg0: i32) -> (i32, i32, i32) {
    %c0_i32 = arith.constant 0 : i32
    %c0_i32_0 = arith.constant 0 : i32
    %c0_i32_1 = arith.constant 0 : i32
    return %arg0, %c0_i32, %c0_i32_0 : i32, i32, i32
  }
  func.func @transform_1(%arg0: i32) -> (i32, i32) {
    %c0_i32 = arith.constant 0 : i32
    %c0_i32_0 = arith.constant 0 : i32
    %c0_i32_1 = arith.constant 0 : i32
    return %c0_i32, %c0_i32_0 : i32, i32
  }
  func.func @transform_2(%arg0: i32) -> (i32, i32) {
    %c0_i32 = arith.constant 0 : i32
    %c0_i32_0 = arith.constant 0 : i32
    %c0_i32_1 = arith.constant 0 : i32
    return %c0_i32, %c0_i32_0 : i32, i32
  }
  func.func @transform_3(%arg0: i32) -> (i32, i32) {
    %c0_i32 = arith.constant 0 : i32
    %c0_i32_0 = arith.constant 0 : i32
    %c0_i32_1 = arith.constant 0 : i32
    return %c0_i32, %c0_i32_0 : i32, i32
  }
  func.func @transform_4(%arg0: i32) -> (i32, i32) {
    %c0_i32 = arith.constant 0 : i32
    %c0_i32_0 = arith.constant 0 : i32
    %c0_i32_1 = arith.constant 0 : i32
    return %c0_i32, %c0_i32_0 : i32, i32
  }
  func.func @transform_5(%arg0: i32) -> (i32, i32, i32) {
    %c0_i32 = arith.constant 0 : i32
    %c0_i32_0 = arith.constant 0 : i32
    %c0_i32_1 = arith.constant 0 : i32
    return %arg0, %c0_i32, %c0_i32_0 : i32, i32, i32
  }
}

</mosaic_0001>

<bundles_post_ra>
// kernel: _rnn_classify_call.1
= control target key start
LH: loop header
LB: loop body
LE: loop exit
PB: predicated region body
PF: predicated region fallthrough
CT: control target
= control target key end

     0   :  { %s1411_s18 = smov 0   ;;  %s1741_s0 = inlined_call_operand.vmem [shape: s32[2,64,128], index: 0, kind: input, shape index: {}]   ;;  %s1742_s1 = inlined_call_operand.vmem [shape: f32[128,128], index: 1, kind: input, shape index: {}]   ;;  %s1743_s2 = inlined_call_operand.vmem [shape: bf16[128,128], index: 2, kind: input, shape index: {}]   ;;  %s1744_s3 = inlined_call_operand.vmem [shape: bf16[128,128], index: 3, kind: input, shape index: {}]   ;;  %s1745_s4 = inlined_call_operand.vmem [shape: f32[1,128], index: 4, kind: input, shape index: {}]   ;;  %s1746_s5 = inlined_call_operand.vmem [shape: f32[2,8,128], index: 5, kind: output, shape index: {}]  }
   0x1 LB: > { %s952_s19 = sadd.s32 4294967295, %s1375_s18   ;;  %p956_p0 = scmp.ge.s32.totalorder %s1375_s18, 1  ;;  %s1375_s18 = sphi %s1411_s18, %s15_s18  }
   0x2   : > { %p187_p1 = scmp.lt.s32.totalorder %s1375_s18, 3 }
   0x4   : > { %p188_p2 = pnand %p956_p0, %p187_p1 }
   0x5   : > { %p214_p3 = scmp.lt.s32.totalorder (!%p188_p2), %s952_s19, 1 }
   0x6   : > { %191 = sbr.rel (%p188_p2) target bundleno = 1933 (0x78d), region = 40 }
   0xb   : > { %v273_v0 = vld [vmem:[%s1742_s1 + $0x78] sm:$0xff]  ;;  %v272_v1 = vld [vmem:[%s1742_s1 + $0x70] sm:$0xff]  ;;  %v1377_v2 = vmov 0.0   ;;  %v271_v4 = vld [vmem:[%s1742_s1 + $0x68] sm:$0xff]  ;;  %vm1378_vm0 = vmmov 0   ;;  %s1748_s19 = smov (!%p214_p3, %s952_s19), 1  ;;  %v224_v8 = vlaneseq }
   0xc   : > { %1101 = vmatprep.subr.mxu0 %v273_v0  ;;  %1145 = vmatprep.subr.bf16.mxu1 %v1377_v2  ;;  %v1429_v3 = vld [vmem:[%s1743_s2 + $0x38] sm:$0xff]   ;;  %v1440_v5 = vld [vmem:[%s1743_s2 + $0x30] sm:$0xff]   ;;  %v270_v6 = vld [vmem:[%s1742_s1 + $0x60] sm:$0xff]  ;;  %s995_s11 = sshll.u32 %s1748_s19, 6  ;;  %v1379_v20 = vmov 1.0   ;;  %v1380_v30 = vmov 0  }
   0xd   : > { %1102 = vmatpush3.msra.mxu0 %v273_v0  ;;  %1161 = vmatprep.mubr.msk.bf16.mxu1 %vm1378_vm0, %v1377_v2  ;;  %v269_v7 = vld [vmem:[%s1742_s1 + $0x58] sm:$0xff]  ;;  %v1455_v9 = vld [vmem:[%s1743_s2 + $0x28] sm:$0xff]   ;;  %v268_v10 = vld [vmem:[%s1742_s1 + $0x50] sm:$0xff]  ;;  %s1468_s20 = scalar_lea.vmem %s1741_s0, %s995_s11  ;;  %v1470_v12 = vand.u32 127, %v224_v8  ;;  %s959_s17 = sshll.u32 %s1748_s19, 3 }
   0xe   : > { %1103 = vmatprep.subr.mxu0 %v272_v1  ;;  %1146 = vmatpush3.bf16.msra.mxu1 %v1429_v3  ;;  %v267_v11 = vld [vmem:[%s1742_s1 + $0x48] sm:$0xff]  ;;  %v1476_v13 = vld [vmem:[%s1743_s2 + $0x20] sm:$0xff]   ;;  %v265_v15 = vld [vmem:[%s1742_s1 + $0x38] sm:$0xff]  ;;  %s222_s25 = scalar_lea.vmem %s1746_s5, %s959_s17 }
   0xf   : > { %1104 = vmatpush3.msra.mxu0 %v272_v1  ;;  %1147 = vmatprep.subr.bf16.mxu1 %v1377_v2  ;;  %v266_v14 = vld [vmem:[%s1742_s1 + $0x40] sm:$0xff]  ;;  %v1488_v16 = vld [vmem:[%s1743_s2 + $0x18] sm:$0xff]   ;;  %v264_v18 = vld [vmem:[%s1742_s1 + $0x30] sm:$0xff] }
  0x10   : > { %1105 = vmatprep.subr.mxu0 %v271_v4  ;;  %v226_v17 = vld [vmem:[%s1468_s20] sm:$0xff]  ;;  %v263_v19 = vld [vmem:[%s1742_s1 + $0x28] sm:$0xff]  ;;  %v1505_v21 = vld [vmem:[%s1743_s2 + $0x10] sm:$0xff]  }
  0x11   : > { %1106 = vmatpush3.msra.mxu0 %v271_v4  ;;  %vm234_vm1 = vcmp.eq.s32.totalorder %v226_v17, %v1470_v12  ;;  %v262_v22 = vld [vmem:[%s1742_s1 + $0x20] sm:$0xff]  ;;  %v261_v23 = vld [vmem:[%s1742_s1 + $0x18] sm:$0xff]  ;;  %v1518_v24 = vld [vmem:[%s1743_s2 + $0x8] sm:$0xff]  }
  0x12   : > { %1107 = vmatprep.subr.mxu0 %v270_v6  ;;  %1148 = vmatpush3.bf16.msra.mxu1 %v1440_v5  ;;  %v260_v25 = vld [vmem:[%s1742_s1 + $0x10] sm:$0xff]  ;;  %v259_v26 = vld [vmem:[%s1742_s1 + $0x8] sm:$0xff]  ;;  %v1531_v27 = vld [vmem:[%s1743_s2] sm:$0xff]  }
  0x13   : > { %1108 = vmatpush3.msra.mxu0 %v270_v6  ;;  %1149 = vmatprep.subr.bf16.mxu1 %v1377_v2  ;;  %v227_v28 = vld [vmem:[%s1468_s20 + $0x8] sm:$0xff]  ;;  %v258_v29 = vld [vmem:[%s1742_s1] sm:$0xff]  ;;  %v228_v31 = vld [vmem:[%s1468_s20 + $0x10] sm:$0xff] }
  0x14   : > { %1109 = vmatprep.subr.mxu0 %v269_v7  ;;  %1133 = vmatprep.mubr.msk.f32.mxu0 %vm234_vm1, %v1379_v20  ;;  %vm235_vm2 = vcmp.eq.s32.totalorder %v227_v28, %v1470_v12  ;;  %vm236_vm3 = vcmp.eq.s32.totalorder %v228_v31, %v1470_v12  ;;  %v229_v32 = vld [vmem:[%s1468_s20 + $0x18] sm:$0xff]  ;;  %v230_v33 = vld [vmem:[%s1468_s20 + $0x20] sm:$0xff]  ;;  %v231_v34 = vld [vmem:[%s1468_s20 + $0x28] sm:$0xff] }
  0x15   : > { %1110 = vmatpush3.msra.mxu0 %v269_v7  ;;  %vm237_vm4 = vcmp.eq.s32.totalorder %v229_v32, %v1470_v12  ;;  %vm238_vm5 = vcmp.eq.s32.totalorder %v230_v33, %v1470_v12  ;;  %vm239_vm6 = vcmp.eq.s32.totalorder %v231_v34, %v1470_v12  ;;  %v232_v35 = vld [vmem:[%s1468_s20 + $0x30] sm:$0xff]  ;;  %v233_v36 = vld [vmem:[%s1468_s20 + $0x38] sm:$0xff]  ;;  %v1348_v34 = vld [vmem:[%s1744_s3 + $0x20] sm:$0xff]  }
  0x16   : > { %1111 = vmatprep.subr.mxu0 %v268_v10  ;;  %1150 = vmatpush3.bf16.msra.mxu1 %v1455_v9  ;;  %vm240_vm7 = vcmp.eq.s32.totalorder %v232_v35, %v1470_v12  ;;  %vm241_vm8 = vcmp.eq.s32.totalorder %v233_v36, %v1470_v12  ;;  %v1349_v35 = vld [vmem:[%s1744_s3 + $0x18] sm:$0xff]   ;;  %v1350_v36 = vld [vmem:[%s1744_s3 + $0x10] sm:$0xff]  }
  0x17   : > { %1112 = vmatpush3.msra.mxu0 %v268_v10  ;;  %1151 = vmatprep.subr.bf16.mxu1 %v1377_v2 }
  0x18   : > { %1113 = vmatprep.subr.mxu0 %v267_v11 }
  0x19   : > { %1114 = vmatpush3.msra.mxu0 %v267_v11 }
  0x1a   : > { %1115 = vmatprep.subr.mxu0 %v266_v14  ;;  %1152 = vmatpush3.bf16.msra.mxu1 %v1476_v13 }
  0x1b   : > { %1116 = vmatpush3.msra.mxu0 %v266_v14  ;;  %1153 = vmatprep.subr.bf16.mxu1 %v1377_v2 }
  0x1c   : > { %1117 = vmatprep.subr.mxu0 %v265_v15 }
  0x1d   : > { %1118 = vmatpush3.msra.mxu0 %v265_v15 }
  0x1e   : > { %1119 = vmatprep.subr.mxu0 %v264_v18  ;;  %1154 = vmatpush3.bf16.msra.mxu1 %v1488_v16 }
  0x1f   : > { %1120 = vmatpush3.msra.mxu0 %v264_v18  ;;  %1155 = vmatprep.subr.bf16.mxu1 %v1377_v2 }
  0x20   : > { %1121 = vmatprep.subr.mxu0 %v263_v19 }
  0x21   : > { %1122 = vmatpush3.msra.mxu0 %v263_v19 }
  0x22   : > { %1123 = vmatprep.subr.mxu0 %v262_v22  ;;  %1156 = vmatpush3.bf16.msra.mxu1 %v1505_v21 }
  0x23   : > { %1124 = vmatpush3.msra.mxu0 %v262_v22  ;;  %1157 = vmatprep.subr.bf16.mxu1 %v1377_v2 }
  0x24   : > { %1125 = vmatprep.subr.mxu0 %v261_v23 }
  0x25   : > { %1126 = vmatpush3.msra.mxu0 %v261_v23 }
  0x26   : > { %1127 = vmatprep.subr.mxu0 %v260_v25  ;;  %1158 = vmatpush3.bf16.msra.mxu1 %v1518_v24 }
  0x27   : > { %1128 = vmatpush3.msra.mxu0 %v260_v25  ;;  %1159 = vmatprep.subr.bf16.mxu1 %v1377_v2 }
  0x28   : > { %1129 = vmatprep.subr.mxu0 %v259_v26 }
  0x29   : > { %1130 = vmatpush3.msra.mxu0 %v259_v26  ;;  %v1347_v26 = vld [vmem:[%s1744_s3 + $0x28] sm:$0xff]  }
  0x2a   : > { %1131 = vmatprep.subr.mxu0 %v258_v29  ;;  %1160 = vmatpush3.bf16.msra.mxu1 %v1531_v27 }
  0x2b   : > { %1132 = vmatpush3.msra.mxu0 %v258_v29  ;;  %1185 = vmatprep.subr.bf16.mxu1 %v1377_v2 }
  0x2c   : > { %1134 = vmatmul.mubr.msk.f32.vlgmr.msra.gmra.mxu0 %vm235_vm2, %v1379_v20  ;;  %1165 = vmatprep.subr.bf16.mxu0 %v1377_v2 }
  0x2d   : > { %1162 = vmatmul.mubr.bf16.vlgmr.msra.gmra.mxu1 %v1380_v30  ;;  %1166 = vmatpush3.bf16.msra.mxu0 %v1429_v3 }
  0x2e   : > { %1167 = vmatprep.subr.bf16.mxu0 %v1377_v2  ;;  %1186 = vmatpush3.bf16.msra.mxu1 %v1429_v3 }
  0x2f   : > { %1187 = vmatprep.subr.bf16.mxu1 %v1377_v2  ;;  %1201 = vmatprep.mubr.msk.bf16.mxu1 %vm1378_vm0, %v1377_v2 }
  0x30   : > { %1136 = vmatprep.mubr.msk.f32.mxu0 %vm236_vm3, %v1379_v20 }
  0x31   : > { %1168 = vmatpush3.bf16.msra.mxu0 %v1440_v5 }
  0x32   : > { %1169 = vmatprep.subr.bf16.mxu0 %v1377_v2  ;;  %1188 = vmatpush3.bf16.msra.mxu1 %v1440_v5 }
  0x33   : > { %1189 = vmatprep.subr.bf16.mxu1 %v1377_v2  ;;  %1137 = vmatmul.mubr.msk.f32.gmra.mxu0 %vm237_vm4, %v1379_v20 }
  0x34   : > { %1139 = vmatprep.mubr.msk.f32.mxu0 %vm238_vm5, %v1379_v20 }
  0x35   : > { %1170 = vmatpush3.bf16.msra.mxu0 %v1455_v9 }
  0x36   : > { %1171 = vmatprep.subr.bf16.mxu0 %v1377_v2  ;;  %1190 = vmatpush3.bf16.msra.mxu1 %v1455_v9 }
  0x37   : > { %1191 = vmatprep.subr.bf16.mxu1 %v1377_v2  ;;  %1140 = vmatmul.mubr.msk.f32.gmra.mxu0 %vm239_vm6, %v1379_v20 }
  0x38   : > { %1142 = vmatprep.mubr.msk.f32.mxu0 %vm240_vm7, %v1379_v20 }
  0x39   : > { %1172 = vmatpush3.bf16.msra.mxu0 %v1476_v13 }
  0x3a   : > { %1173 = vmatprep.subr.bf16.mxu0 %v1377_v2  ;;  %1192 = vmatpush3.bf16.msra.mxu1 %v1476_v13 }
  0x3b   : > { %1193 = vmatprep.subr.bf16.mxu1 %v1377_v2  ;;  %1143 = vmatmul.mubr.msk.f32.gmra.mxu0 %vm241_vm8, %v1379_v20 }
  0x3c   : > { %1181 = vmatprep.mubr.msk.bf16.mxu0 %vm1378_vm0, %v1377_v2 }
  0x3d   : > { %1174 = vmatpush3.bf16.msra.mxu0 %v1488_v16 }
  0x3e   : > { %1175 = vmatprep.subr.bf16.mxu0 %v1377_v2  ;;  %1194 = vmatpush3.bf16.msra.mxu1 %v1488_v16 }
  0x3f   : > { %1195 = vmatprep.subr.bf16.mxu1 %v1377_v2 }
  0x41   : > { %1176 = vmatpush3.bf16.msra.mxu0 %v1505_v21 }
  0x42   : > { %1177 = vmatprep.subr.bf16.mxu0 %v1377_v2  ;;  %1196 = vmatpush3.bf16.msra.mxu1 %v1505_v21 }
  0x43   : > { %1197 = vmatprep.subr.bf16.mxu1 %v1377_v2 }
  0x45   : > { %1178 = vmatpush3.bf16.msra.mxu0 %v1518_v24 }
  0x46   : > { %1179 = vmatprep.subr.bf16.mxu0 %v1377_v2  ;;  %1198 = vmatpush3.bf16.msra.mxu1 %v1518_v24 }
  0x47   : > { %1199 = vmatprep.subr.bf16.mxu1 %v1377_v2 }
  0x49   : > { %1180 = vmatpush3.bf16.msra.mxu0 %v1531_v27 }
  0x4a   : > { %1200 = vmatpush3.bf16.msra.mxu1 %v1531_v27  ;;  %1205 = vmatprep.subr.bf16.mxu0 %v1377_v2 }
  0x4b   : > { %1225 = vmatprep.subr.bf16.mxu1 %v1377_v2 }
  0xec   : > { %v1135_v37 = vpop.f32.mrf.mxu0 }
  0xed   : > { %v477_v38 = vpop.f32.mrf.mxu1 }
  0xee   : > { %v340_v39 = vpop.f32.mrf.mxu0 }
  0xef   : > { %v483_v40 = vadd.f32 %v477_v38, %v340_v39  ;;  %v1163_v41 = vpop.f32.mrf.mxu1  ;;  %v1352_v38 = vld [vmem:[%s1744_s3] sm:$0xff]  }
  0xf1   : > { %1353 = vtanh.f32 %v483_v40  ;;  %v480_v42 = vpop.f32.mrf.mxu1 }
  0xf3   : > { %v1164_v43 = vpop.f32.mrf.mxu1  ;;  %v1138_v46 = vpop.f32.mrf.mxu0 }
  0xf5   : > { %v350_v47 = vpop.f32.mrf.mxu0 }
  0xf7   : > { %v1615_v48 = vpop.f32.mrf.mxu0 }
  0xf9   : > { %v1617_v49 = vpop.f32.mrf.mxu0 }
  0xfb   : > { %v1619_v50 = vpop.f32.mrf.mxu0 }
  0xfd   : > { %v1621_v51 = vpop.f32.mrf.mxu0 }
  0xfe   : > { %v1354_v44 = vpop.eup %1353 }
  0xff   : > { %v485_v45 = vpack.c.bf16 %v1354_v44, %v1354_v44 }
 0x101   : > { %1182 = vmatmul.mubr.bf16.vlgmr.msra.gmra.mxu0 %v485_v45 }
 0x102   : > { %1206 = vmatpush3.bf16.msra.mxu0 %v1429_v3  ;;  %1221 = vmatprep.mubr.msk.bf16.mxu0 %vm1378_vm0, %v1377_v2 }
 0x103   : > { %1207 = vmatprep.subr.bf16.mxu0 %v1377_v2 }
 0x106   : > { %1208 = vmatpush3.bf16.msra.mxu0 %v1440_v5 }
 0x107   : > { %1209 = vmatprep.subr.bf16.mxu0 %v1377_v2 }
 0x10a   : > { %1210 = vmatpush3.bf16.msra.mxu0 %v1455_v9 }
 0x10b   : > { %1211 = vmatprep.subr.bf16.mxu0 %v1377_v2 }
 0x10e   : > { %1212 = vmatpush3.bf16.msra.mxu0 %v1476_v13 }
 0x10f   : > { %1213 = vmatprep.subr.bf16.mxu0 %v1377_v2 }
 0x112   : > { %1214 = vmatpush3.bf16.msra.mxu0 %v1488_v16 }
 0x113   : > { %1215 = vmatprep.subr.bf16.mxu0 %v1377_v2 }
 0x116   : > { %1216 = vmatpush3.bf16.msra.mxu0 %v1505_v21 }
 0x117   : > { %1217 = vmatprep.subr.bf16.mxu0 %v1377_v2 }
 0x11a   : > { %1218 = vmatpush3.bf16.msra.mxu0 %v1518_v24 }
 0x11b   : > { %1219 = vmatprep.subr.bf16.mxu0 %v1377_v2 }
 0x11e   : > { %1220 = vmatpush3.bf16.msra.mxu0 %v1531_v27 }
 0x11f   : > { %1245 = vmatprep.subr.bf16.mxu0 %v1377_v2 }
 0x1c1   : > { %v520_v52 = vpop.f32.mrf.mxu0 }
 0x1c2   : > { %v526_v53 = vadd.f32 %v1135_v37, %v520_v52  ;;  %v1351_v37 = vld [vmem:[%s1744_s3 + $0x8] sm:$0xff]  }
 0x1c3   : > { %v1183_v54 = vpop.f32.mrf.mxu0 }
 0x1c4   : > { %1355 = vtanh.f32 %v526_v53 }
 0x1c5   : > { %v523_v55 = vpop.f32.mrf.mxu0 }
 0x1c7   : > { %v1184_v56 = vpop.f32.mrf.mxu0 }
 0x1d1   : > { %v1356_v57 = vpop.eup %1355 }
 0x1d2   : > { %v528_v58 = vpack.c.bf16 %v1356_v57, %v1356_v57 }
 0x1d4   : > { %1202 = vmatmul.mubr.bf16.vlgmr.msra.gmra.mxu1 %v528_v58 }
 0x1d5   : > { %1226 = vmatpush3.bf16.msra.mxu1 %v1429_v3  ;;  %1241 = vmatprep.mubr.msk.bf16.mxu1 %vm1378_vm0, %v1377_v2 }
 0x1d6   : > { %1227 = vmatprep.subr.bf16.mxu1 %v1377_v2 }
 0x1d9   : > { %1228 = vmatpush3.bf16.msra.mxu1 %v1440_v5 }
 0x1da   : > { %1229 = vmatprep.subr.bf16.mxu1 %v1377_v2 }
 0x1dd   : > { %1230 = vmatpush3.bf16.msra.mxu1 %v1455_v9 }
 0x1de   : > { %1231 = vmatprep.subr.bf16.mxu1 %v1377_v2 }
 0x1e1   : > { %1232 = vmatpush3.bf16.msra.mxu1 %v1476_v13 }
 0x1e2   : > { %1233 = vmatprep.subr.bf16.mxu1 %v1377_v2 }
 0x1e5   : > { %1234 = vmatpush3.bf16.msra.mxu1 %v1488_v16 }
 0x1e6   : > { %1235 = vmatprep.subr.bf16.mxu1 %v1377_v2 }
 0x1e9   : > { %1236 = vmatpush3.bf16.msra.mxu1 %v1505_v21 }
 0x1ea   : > { %1237 = vmatprep.subr.bf16.mxu1 %v1377_v2 }
 0x1ed   : > { %1238 = vmatpush3.bf16.msra.mxu1 %v1518_v24 }
 0x1ee   : > { %1239 = vmatprep.subr.bf16.mxu1 %v1377_v2 }
 0x1f1   : > { %1240 = vmatpush3.bf16.msra.mxu1 %v1531_v27 }
 0x1f2   : > { %1265 = vmatprep.subr.bf16.mxu1 %v1377_v2 }
 0x294   : > { %v563_v59 = vpop.f32.mrf.mxu1 }
 0x295   : > { %v569_v60 = vadd.f32 %v563_v59, %v350_v47 }
 0x296   : > { %v1203_v61 = vpop.f32.mrf.mxu1 }
 0x297   : > { %1357 = vtanh.f32 %v569_v60 }
 0x298   : > { %v566_v62 = vpop.f32.mrf.mxu1 }
 0x29a   : > { %v1204_v63 = vpop.f32.mrf.mxu1 }
 0x2a4   : > { %v1358_v0 = vpop.eup %1357 }
 0x2a5   : > { %v571_v1 = vpack.c.bf16 %v1358_v0, %v1358_v0 }
 0x2a7   : > { %1222 = vmatmul.mubr.bf16.vlgmr.msra.gmra.mxu0 %v571_v1 }
 0x2a8   : > { %1246 = vmatpush3.bf16.msra.mxu0 %v1429_v3  ;;  %1261 = vmatprep.mubr.msk.bf16.mxu0 %vm1378_vm0, %v1377_v2 }
 0x2a9   : > { %1247 = vmatprep.subr.bf16.mxu0 %v1377_v2 }
 0x2ac   : > { %1248 = vmatpush3.bf16.msra.mxu0 %v1440_v5 }
 0x2ad   : > { %1249 = vmatprep.subr.bf16.mxu0 %v1377_v2 }
 0x2b0   : > { %1250 = vmatpush3.bf16.msra.mxu0 %v1455_v9 }
 0x2b1   : > { %1251 = vmatprep.subr.bf16.mxu0 %v1377_v2 }
 0x2b4   : > { %1252 = vmatpush3.bf16.msra.mxu0 %v1476_v13 }
 0x2b5   : > { %1253 = vmatprep.subr.bf16.mxu0 %v1377_v2 }
 0x2b8   : > { %1254 = vmatpush3.bf16.msra.mxu0 %v1488_v16 }
 0x2b9   : > { %1255 = vmatprep.subr.bf16.mxu0 %v1377_v2 }
 0x2bc   : > { %1256 = vmatpush3.bf16.msra.mxu0 %v1505_v21 }
 0x2bd   : > { %1257 = vmatprep.subr.bf16.mxu0 %v1377_v2 }
 0x2c0   : > { %1258 = vmatpush3.bf16.msra.mxu0 %v1518_v24 }
 0x2c1   : > { %1259 = vmatprep.subr.bf16.mxu0 %v1377_v2 }
 0x2c4   : > { %1260 = vmatpush3.bf16.msra.mxu0 %v1531_v27 }
 0x2c5   : > { %1285 = vmatprep.subr.bf16.mxu0 %v1377_v2 }
 0x367   : > { %v606_v4 = vpop.f32.mrf.mxu0 }
 0x368   : > { %v612_v6 = vadd.f32 %v1138_v46, %v606_v4 }
 0x369   : > { %v1223_v7 = vpop.f32.mrf.mxu0 }
 0x36a   : > { %1359 = vtanh.f32 %v612_v6 }
 0x36b   : > { %v609_v8 = vpop.f32.mrf.mxu0 }
 0x36d   : > { %v1224_v10 = vpop.f32.mrf.mxu0 }
 0x377   : > { %v1360_v11 = vpop.eup %1359 }
 0x378   : > { %v614_v12 = vpack.c.bf16 %v1360_v11, %v1360_v11 }
 0x37a   : > { %1242 = vmatmul.mubr.bf16.vlgmr.msra.gmra.mxu1 %v614_v12 }
 0x37b   : > { %1266 = vmatpush3.bf16.msra.mxu1 %v1429_v3  ;;  %1281 = vmatprep.mubr.msk.bf16.mxu1 %vm1378_vm0, %v1377_v2 }
 0x37c   : > { %1267 = vmatprep.subr.bf16.mxu1 %v1377_v2 }
 0x37f   : > { %1268 = vmatpush3.bf16.msra.mxu1 %v1440_v5 }
 0x380   : > { %1269 = vmatprep.subr.bf16.mxu1 %v1377_v2 }
 0x383   : > { %1270 = vmatpush3.bf16.msra.mxu1 %v1455_v9 }
 0x384   : > { %1271 = vmatprep.subr.bf16.mxu1 %v1377_v2 }
 0x387   : > { %1272 = vmatpush3.bf16.msra.mxu1 %v1476_v13 }
 0x388   : > { %1273 = vmatprep.subr.bf16.mxu1 %v1377_v2 }
 0x38b   : > { %1274 = vmatpush3.bf16.msra.mxu1 %v1488_v16 }
 0x38c   : > { %1275 = vmatprep.subr.bf16.mxu1 %v1377_v2 }
 0x38f   : > { %1276 = vmatpush3.bf16.msra.mxu1 %v1505_v21 }
 0x390   : > { %1277 = vmatprep.subr.bf16.mxu1 %v1377_v2 }
 0x393   : > { %1278 = vmatpush3.bf16.msra.mxu1 %v1518_v24 }
 0x394   : > { %1279 = vmatprep.subr.bf16.mxu1 %v1377_v2 }
 0x397   : > { %1280 = vmatpush3.bf16.msra.mxu1 %v1531_v27 }
 0x398   : > { %1305 = vmatprep.subr.bf16.mxu1 %v1377_v2 }
 0x43a   : > { %v649_v14 = vpop.f32.mrf.mxu1 }
 0x43b   : > { %v655_v15 = vadd.f32 %v649_v14, %v1617_v49 }
 0x43c   : > { %v1243_v17 = vpop.f32.mrf.mxu1 }
 0x43d   : > { %1361 = vtanh.f32 %v655_v15 }
 0x43e   : > { %v652_v18 = vpop.f32.mrf.mxu1 }
 0x440   : > { %v1244_v19 = vpop.f32.mrf.mxu1 }
 0x44a   : > { %v1362_v20 = vpop.eup %1361 }
 0x44b   : > { %v657_v22 = vpack.c.bf16 %v1362_v20, %v1362_v20 }
 0x44d   : > { %1262 = vmatmul.mubr.bf16.vlgmr.msra.gmra.mxu0 %v657_v22 }
 0x44e   : > { %1286 = vmatpush3.bf16.msra.mxu0 %v1429_v3  ;;  %1301 = vmatprep.mubr.msk.bf16.mxu0 %vm1378_vm0, %v1377_v2 }
 0x44f   : > { %1287 = vmatprep.subr.bf16.mxu0 %v1377_v2 }
 0x452   : > { %1288 = vmatpush3.bf16.msra.mxu0 %v1440_v5 }
 0x453   : > { %1289 = vmatprep.subr.bf16.mxu0 %v1377_v2 }
 0x456   : > { %1290 = vmatpush3.bf16.msra.mxu0 %v1455_v9 }
 0x457   : > { %1291 = vmatprep.subr.bf16.mxu0 %v1377_v2 }
 0x45a   : > { %1292 = vmatpush3.bf16.msra.mxu0 %v1476_v13 }
 0x45b   : > { %1293 = vmatprep.subr.bf16.mxu0 %v1377_v2 }
 0x45e   : > { %1294 = vmatpush3.bf16.msra.mxu0 %v1488_v16 }
 0x45f   : > { %1295 = vmatprep.subr.bf16.mxu0 %v1377_v2 }
 0x462   : > { %1296 = vmatpush3.bf16.msra.mxu0 %v1505_v21  ;;  %v1345_v21 = vld [vmem:[%s1744_s3 + $0x38] sm:$0xff]  }
 0x463   : > { %1297 = vmatprep.subr.bf16.mxu0 %v1377_v2 }
 0x466   : > { %1298 = vmatpush3.bf16.msra.mxu0 %v1518_v24  ;;  %v1346_v24 = vld [vmem:[%s1744_s3 + $0x30] sm:$0xff]  }
 0x467   : > { %1299 = vmatprep.subr.bf16.mxu0 %v1377_v2 }
 0x46a   : > { %1300 = vmatpush3.bf16.msra.mxu0 %v1531_v27 }
 0x50d   : > { %v692_v3 = vpop.f32.mrf.mxu0 }
 0x50e   : > { %v698_v5 = vadd.f32 %v1615_v48, %v692_v3 }
 0x50f   : > { %v1263_v9 = vpop.f32.mrf.mxu0 }
 0x510   : > { %1363 = vtanh.f32 %v698_v5 }
 0x511   : > { %v695_v13 = vpop.f32.mrf.mxu0 }
 0x513   : > { %v1264_v23 = vpop.f32.mrf.mxu0 }
 0x51d   : > { %v1364_v16 = vpop.eup %1363 }
 0x51e   : > { %v700_v25 = vpack.c.bf16 %v1364_v16, %v1364_v16 }
 0x520   : > { %1282 = vmatmul.mubr.bf16.vlgmr.msra.gmra.mxu1 %v700_v25 }
 0x521   : > { %1321 = vmatprep.mubr.msk.bf16.mxu1 %vm1378_vm0, %v1377_v2  ;;  %1306 = vmatpush3.bf16.msra.mxu1 %v1345_v21 }
 0x522   : > { %1307 = vmatprep.subr.bf16.mxu1 %v1377_v2 }
 0x525   : > { %1308 = vmatpush3.bf16.msra.mxu1 %v1346_v24 }
 0x526   : > { %1309 = vmatprep.subr.bf16.mxu1 %v1377_v2 }
 0x529   : > { %1310 = vmatpush3.bf16.msra.mxu1 %v1347_v26 }
 0x52a   : > { %1311 = vmatprep.subr.bf16.mxu1 %v1377_v2 }
 0x52d   : > { %1312 = vmatpush3.bf16.msra.mxu1 %v1348_v34 }
 0x52e   : > { %1313 = vmatprep.subr.bf16.mxu1 %v1377_v2 }
 0x531   : > { %1314 = vmatpush3.bf16.msra.mxu1 %v1349_v35 }
 0x532   : > { %1315 = vmatprep.subr.bf16.mxu1 %v1377_v2 }
 0x535   : > { %1316 = vmatpush3.bf16.msra.mxu1 %v1350_v36 }
 0x536   : > { %1317 = vmatprep.subr.bf16.mxu1 %v1377_v2 }
 0x539   : > { %1318 = vmatpush3.bf16.msra.mxu1 %v1351_v37 }
 0x53a   : > { %1319 = vmatprep.subr.bf16.mxu1 %v1377_v2  ;;  %v984_v2 = vld [vmem:[%s1745_s4] ss:$0 sm:$0xff] }
 0x53d   : > { %1320 = vmatpush3.bf16.msra.mxu1 %v1352_v38 }
 0x5e0   : > { %v735_v27 = vpop.f32.mrf.mxu1 }
 0x5e1   : > { %v741_v28 = vadd.f32 %v735_v27, %v1621_v51 }
 0x5e2   : > { %v1283_v29 = vpop.f32.mrf.mxu1 }
 0x5e3   : > { %1365 = vtanh.f32 %v741_v28 }
 0x5e4   : > { %v738_v30 = vpop.f32.mrf.mxu1 }
 0x5e6   : > { %v1284_v31 = vpop.f32.mrf.mxu1 }
 0x5f0   : > { %v1366_v32 = vpop.eup %1365 }
 0x5f1   : > { %v743_v33 = vpack.c.bf16 %v1366_v32, %v1366_v32 }
 0x5f3   : > { %1302 = vmatmul.mubr.bf16.vlgmr.msra.gmra.mxu0 %v743_v33 }
 0x6b3   : > { %v778_v39 = vpop.f32.mrf.mxu0 }
 0x6b4   : > { %v784_v40 = vadd.f32 %v1619_v50, %v778_v39 }
 0x6b5   : > { %v1303_v41 = vpop.f32.mrf.mxu0 }
 0x6b6   : > { %1367 = vtanh.f32 %v784_v40 }
 0x6b7   : > { %v781_v42 = vpop.f32.mrf.mxu0 }
 0x6b9   : > { %v1304_v43 = vpop.f32.mrf.mxu0 }
 0x6c3   : > { %v1368_v44 = vpop.eup %1367 }
 0x6c4   : > { %v786_v45 = vpack.c.bf16 %v1368_v44, %v1368_v44 }
 0x6c6   : > { %1322 = vmatmul.mubr.bf16.vlgmr.msra.gmra.mxu1 %v786_v45 }
 0x786   : > { %v892_v46 = vpop.f32.mrf.mxu1 }
 0x787   : > { %v893_v47 = vadd.f32 %v984_v2, %v892_v46 }
 0x788   : > { %v1323_v48 = vpop.f32.mrf.mxu1 }
 0x789   : > { %898 = vst [vmem:[%s222_s25] sm:$0xff] %v893_v47 }
 0x78a   : > { %v895_v49 = vpop.f32.mrf.mxu1 }
 0x78c   : > { %v1324_v50 = vpop.f32.mrf.mxu1 }
 0x78d PF: > { %s15_s18 = sadd.s32 1, %s1375_s18  }
 0x78e   : > { %p12_p4 = scmp.ge.s32.totalorder %s15_s18, 4  }
 0x790   :  { %14 = sbr.rel (!%p12_p4) target bundleno = 1 (0x1), region = 70 }

</bundles_post_ra>
